<compile_context>
chip_gen: v5e
topology: v5e:2x2
jax: 0.10.0
libtpu: 0.0.40
codegen_flags: <defaults>
</compile_context>

<pallas_src>
import functools

import jax
import jax.numpy as jnp
from jax.experimental import pallas as pl
from jax.experimental.pallas import tpu as pltpu


_BIG = 1.0e30  # large-but-finite sentinel: sentinel-sentinel stays finite (no inf-inf NaN)


def _round_up(x, m):
    return ((x + m - 1) // m) * m


def _cdiv(a, b):
    return -(-a // b)


def _pmrl_kernel(a_ref, b_ref, out_sum_ref, out_cnt_ref, *, c_chunk, remove_easy):
    """One (i-block, class-chunk, j-block) step.

    a_ref : (T_i, c_chunk)   positive view: pred[i,c] where target[i,c] != 0, else +1e30
    b_ref : (c_chunk, T_j)   negative view: pred[j,c] + margin where target[j,c] != 1, else -1e30
    Per class the pairwise loss tile is relu(b[c,j] - a[i,c]); the sentinels make
    every invalid / padded (i, j, c) combination contribute exactly 0.
    """
    # Zero this i-block's accumulators at the start of its (class, j) reduction sweep.
    @pl.when((pl.program_id(1) == 0) & (pl.program_id(2) == 0))
    def _init():
        out_sum_ref[...] = jnp.zeros_like(out_sum_ref)
        out_cnt_ref[...] = jnp.zeros_like(out_cnt_ref)

    a = a_ref[...]                      # (T_i, c_chunk)
    b = b_ref[...]                      # (c_chunk, T_j)
    t_i = a.shape[0]

    s_rows = jnp.zeros((t_i, 1), jnp.float32)
    c_rows = jnp.zeros((t_i, 1), jnp.float32) if remove_easy else None

    # Static class loop (c_chunk <= 128): per class one (T_i sublane x T_j lane)
    # diff tile -> sub + relu + lane-reduce; no 3D temporary, no mask multiplies.
    for c in range(c_chunk):
        a_col = a[:, c:c + 1]           # (T_i, 1), broadcast across the j lanes
        b_row = b[c:c + 1, :]           # (1, T_j), broadcast across the i sublanes
        diff = b_row - a_col            # (T_i, T_j) pairwise margin differences
        loss = jnp.maximum(diff, 0.0)
        s_rows = s_rows + jnp.sum(loss.astype(jnp.float32), axis=1, keepdims=True)
        if remove_easy:
            # non-easy pairs == strictly positive loss, taken from the pre-relu diff
            c_rows = c_rows + jnp.sum((diff > 0.0).astype(jnp.float32),
                                      axis=1, keepdims=True)

    # One sublane reduce per grid step; the (1,1) partial broadcasts over the
    # (8,128) per-i-block accumulator tile (every element holds the same total).
    out_sum_ref[...] += jnp.sum(s_rows, axis=0, keepdims=True)
    if remove_easy:
        out_cnt_ref[...] += jnp.sum(c_rows, axis=0, keepdims=True)


def pairwise_margin_ranking_loss(pred, target, *, margin=0.0, reduction='mean',
                                 remove_easy=False, sampling_ratio=1,
                                 block_i=512, block_j=512,
                                 compute_dtype=jnp.float32,
                                 vmem_limit_bytes=None):
    """pred: [N, C] scores, target: [N, C] binary labels -> scalar loss."""
    assert reduction in ['none', 'mean', 'sum'], f"Unsupported reduction {reduction}"
    if reduction == 'none':
        # TODO(synk): reduction='none' returns a variable-length vector of per-pair
        # losses, which has no fixed-shape Pallas output; only 'mean'/'sum' here.
        raise NotImplementedError("reduction='none' is not supported by the Pallas kernel")
    if sampling_ratio != 1:
        # TODO(synk): sampling_ratio != 1 uses torch.randperm random subsampling
        # (and is buggy in the reference); not implemented.
        raise NotImplementedError("sampling_ratio != 1 is not supported by the Pallas kernel")

    N, C = pred.shape
    pred_f = pred.astype(jnp.float32)
    pos = target != 0          # candidate positives (torch: target.nonzero())
    neg = target != 1          # candidate negatives (torch: (1 - target).nonzero())

    # Sentinel pre-masking: fold the pair masks and the margin into the inputs.
    a = jnp.where(pos, pred_f, _BIG)                    # (N, C)
    b = jnp.where(neg, pred_f + float(margin), -_BIG)   # (N, C)

    # Class handling: no padding at all for C <= 128 (full-extent block), otherwise
    # 128-class chunks on a grid axis (kernel unrolls at most 128 classes).
    if C <= 128:
        c_eff, c_chunk = C, C
    else:
        c_eff, c_chunk = _round_up(C, 128), 128
    n_c_blocks = c_eff // c_chunk

    # Negative samples (j) live on the lane axis -> full vreg utilization for any C.
    n8 = _round_up(max(N, 1), 8)
    t_j = min(int(block_j), _round_up(max(N, 1), 128))
    t_j = max(128, (t_j // 128) * 128)

    # Size T_i so each grid step covers ~2M pair-elements (amortizes the ~600-cycle
    # per-step overhead), capped by block_i / N, and aim for >= 4 i-blocks so the
    # two v7x TensorCores stay balanced on the "parallel" i axis.
    budget = (2 * 1024 * 1024) // max(c_chunk * t_j, 1)
    t_i = max(8, (budget // 8) * 8)
    t_i = min(t_i, max(8, (int(block_i) // 8) * 8), n8)
    t_i = min(t_i, max(8, _round_up(_cdiv(n8, 4), 8)))

    n_pad_i = _round_up(n8, t_i)
    n_pad_j = _round_up(max(N, 1), t_j)
    n_i_blocks = n_pad_i // t_i
    n_j_blocks = n_pad_j // t_j

    # Pads carry the sentinel of their side so they contribute exactly 0.
    a_p = jnp.pad(a, ((0, n_pad_i - N), (0, c_eff - C)),
                  constant_values=_BIG).astype(compute_dtype)
    b_p = jnp.pad(b.T, ((0, c_eff - C), (0, n_pad_j - N)),
                  constant_values=-_BIG).astype(compute_dtype)

    kernel = functools.partial(_pmrl_kernel, c_chunk=c_chunk,
                               remove_easy=bool(remove_easy))

    out_sum, out_cnt = pl.pallas_call(
        kernel,
        out_shape=(jax.ShapeDtypeStruct((n_i_blocks * 8, 128), jnp.float32),
                   jax.ShapeDtypeStruct((n_i_blocks * 8, 128), jnp.float32)),
        grid_spec=pltpu.PrefetchScalarGridSpec(
            num_scalar_prefetch=0,
            grid=(n_i_blocks, n_c_blocks, n_j_blocks),      # (i: parallel, c, j: reductions)
            in_specs=[
                pl.BlockSpec((t_i, c_chunk), lambda i, c, j: (i, c)),   # positive view
                pl.BlockSpec((c_chunk, t_j), lambda i, c, j: (c, j)),   # negative view (transposed)
            ],
            out_specs=[
                pl.BlockSpec((8, 128), lambda i, c, j: (i, 0)),
                pl.BlockSpec((8, 128), lambda i, c, j: (i, 0)),
            ],
        ),
        compiler_params=pltpu.CompilerParams(
            dimension_semantics=("parallel", "arbitrary", "arbitrary"),
            vmem_limit_bytes=vmem_limit_bytes,
        ),
    )(a_p, b_p)

    # Tiny cross-block merge in plain JAX (also merges per-core partials on v7x).
    total_sum = jnp.sum(out_sum.reshape(n_i_blocks, 8, 128)[:, 0, 0])
    if reduction == 'sum':
        return total_sum

    if remove_easy:
        denom = jnp.sum(out_cnt.reshape(n_i_blocks, 8, 128)[:, 0, 0])
    else:
        # #valid (positive, negative, class) triples — hoisted out of the kernel.
        denom = jnp.sum(jnp.sum(pos, axis=0).astype(jnp.float32)
                        * jnp.sum(neg, axis=0).astype(jnp.float32))
    # 'mean': NaN when there are no (remaining) pairs, matching torch.mean([]).
    return total_sum / denom


def _reference(pred, target, margin, remove_easy=False, reduction='mean'):
    """Pure-JAX reference with identical semantics to the PyTorch forward."""
    pos = (target != 0).astype(jnp.float32)
    neg = (target != 1).astype(jnp.float32)
    valid = pos[:, None, :] * neg[None, :, :]
    l = jnp.maximum(margin + pred[None, :, :] - pred[:, None, :], 0.0) * valid
    if reduction == 'sum':
        return jnp.sum(l)
    denom = jnp.sum((l > 0).astype(jnp.float32)) if remove_easy else jnp.sum(valid)
    return jnp.sum(l) / denom


if __name__ == "__main__":
    key = jax.random.PRNGKey(0)
    k1, k2, k3, k4 = jax.random.split(key, 4)

    # Small case: N=8 samples, C=4 classes.
    N, C = 8, 4
    pred = jax.random.uniform(k1, (N, C), dtype=jnp.float32)
    target = (jax.random.uniform(k2, (N, C)) < 0.5).astype(jnp.float32)
    margin = 0.3

    out = jax.block_until_ready(pairwise_margin_ranking_loss(pred, target, margin=margin))
    ref = _reference(pred, target, margin)
    assert jnp.allclose(out, ref, atol=1e-5, rtol=1e-5), (float(out), float(ref))

    # Docstring example from the PyTorch module (margin=0.5) -> ~0.4185
    pred_d = jnp.array([[0.0706, 0.8677], [0.6481, 0.7287], [0.2627, 0.0302]], jnp.float32)
    target_d = jnp.array([[0., 1.], [1., 0.], [0., 1.]], jnp.float32)
    out_d = jax.block_until_ready(
        pairwise_margin_ranking_loss(pred_d, target_d, margin=0.5))
    assert jnp.allclose(out_d, 0.418525, atol=1e-3), float(out_d)

    # remove_easy=True
    out_re = jax.block_until_ready(
        pairwise_margin_ranking_loss(pred, target, margin=margin, remove_easy=True))
    ref_re = _reference(pred, target, margin, remove_easy=True)
    assert jnp.allclose(out_re, ref_re, atol=1e-5, rtol=1e-5), (float(out_re), float(ref_re))

    # reduction='sum'
    out_sum = jax.block_until_ready(
        pairwise_margin_ranking_loss(pred, target, margin=margin, reduction='sum'))
    ref_sum = _reference(pred, target, margin, reduction='sum')
    assert jnp.allclose(out_sum, ref_sum, atol=1e-5, rtol=1e-5), (float(out_sum), float(ref_sum))

    # Multi-block case (exercises i/j tiling, row/column padding and the merge).
    N2, C2 = 200, 6
    pred2 = jax.random.uniform(k3, (N2, C2), dtype=jnp.float32)
    target2 = (jax.random.uniform(k4, (N2, C2)) < 0.3).astype(jnp.float32)
    out2 = jax.block_until_ready(
        pairwise_margin_ranking_loss(pred2, target2, margin=0.2))
    ref2 = _reference(pred2, target2, 0.2)
    assert jnp.allclose(out2, ref2, atol=1e-4, rtol=1e-4), (float(out2), float(ref2))
    out2s = jax.block_until_ready(
        pairwise_margin_ranking_loss(pred2, target2, margin=0.2, reduction='sum'))
    ref2s = _reference(pred2, target2, 0.2, reduction='sum')
    assert jnp.allclose(out2s, ref2s, atol=1e-2, rtol=1e-4), (float(out2s), float(ref2s))

    print("KERNEL_OK")
</pallas_src>

<mosaic_0001>
module attributes {stable_mosaic.version = 11 : i64} {
  func.func @_pmrl_kernel(%arg0: i32, %arg1: i32, %arg2: i32, %arg3: memref<8x4xf32, #tpu.memory_space<vmem>>, %arg4: memref<4x128xf32, #tpu.memory_space<vmem>>, %arg5: memref<8x128xf32, #tpu.memory_space<vmem>>, %arg6: memref<8x128xf32, #tpu.memory_space<vmem>>) attributes {dimension_semantics = [#tpu.dimension_semantics<parallel>, #tpu.dimension_semantics<arbitrary>, #tpu.dimension_semantics<arbitrary>], iteration_bounds = array<i64: 1, 1, 1>, scalar_prefetch = 0 : i64, scratch_operands = 0 : i64, tpu.core_type = #tpu.core_type<tc>, window_params = [{transform_indices = @transform_0, window_bounds = array<i64: 8, 4>}, {transform_indices = @transform_1, window_bounds = array<i64: 4, 128>}, {transform_indices = @transform_2, window_bounds = array<i64: 8, 128>}, {transform_indices = @transform_3, window_bounds = array<i64: 8, 128>}]} {
    %c0_i32 = arith.constant 0 : i32
    %0 = arith.cmpi eq, %arg1, %c0_i32 : i32
    %c0_i32_0 = arith.constant 0 : i32
    %1 = arith.cmpi eq, %arg2, %c0_i32_0 : i32
    %2 = arith.andi %0, %1 : i1
    %3 = arith.extui %2 : i1 to i32
    %c0_i32_1 = arith.constant 0 : i32
    %4 = arith.cmpi ne, %3, %c0_i32_1 : i32
    scf.if %4 {
      %cst_18 = arith.constant 0.000000e+00 : f32
      %54 = vector.broadcast %cst_18 : f32 to vector<8x128xf32>
      %c0_19 = arith.constant 0 : index
      %c0_20 = arith.constant 0 : index
      %55 = vector.load %arg5[%c0_19, %c0_20] : memref<8x128xf32, #tpu.memory_space<vmem>>, vector<8x128xf32>
      tpu.vector_store %arg5[%c0_19, %c0_20], %54 {strides = array<i32>} : memref<8x128xf32, #tpu.memory_space<vmem>>, vector<8x128xf32>,
      %cst_21 = arith.constant 0.000000e+00 : f32
      %56 = vector.broadcast %cst_21 : f32 to vector<8x128xf32>
      %c0_22 = arith.constant 0 : index
      %c0_23 = arith.constant 0 : index
      %57 = vector.load %arg6[%c0_22, %c0_23] : memref<8x128xf32, #tpu.memory_space<vmem>>, vector<8x128xf32>
      tpu.vector_store %arg6[%c0_22, %c0_23], %56 {strides = array<i32>} : memref<8x128xf32, #tpu.memory_space<vmem>>, vector<8x128xf32>,
    } else {
    }
    %c0 = arith.constant 0 : index
    %c0_2 = arith.constant 0 : index
    %5 = vector.load %arg3[%c0, %c0_2] : memref<8x4xf32, #tpu.memory_space<vmem>>, vector<8x4xf32>
    %c0_3 = arith.constant 0 : index
    %c0_4 = arith.constant 0 : index
    %6 = vector.load %arg4[%c0_3, %c0_4] : memref<4x128xf32, #tpu.memory_space<vmem>>, vector<4x128xf32>
    %cst = arith.constant 0.000000e+00 : f32
    %7 = vector.broadcast %cst : f32 to vector<8x1xf32>
    %8 = vector.extract_strided_slice %5 {offsets = [0, 0], sizes = [8, 1], strides = [1, 1]} : vector<8x4xf32> to vector<8x1xf32>
    %9 = vector.extract_strided_slice %6 {offsets = [0, 0], sizes = [1, 128], strides = [1, 1]} : vector<4x128xf32> to vector<1x128xf32>
    %10 = vector.broadcast %9 : vector<1x128xf32> to vector<8x128xf32>
    %11 = vector.broadcast %8 : vector<8x1xf32> to vector<8x128xf32>
    %12 = arith.subf %10, %11 : vector<8x128xf32>
    %cst_5 = arith.constant 0.000000e+00 : f32
    %13 = vector.broadcast %cst_5 : f32 to vector<8x128xf32>
    %14 = arith.maximumf %12, %13 : vector<8x128xf32>
    %cst_6 = arith.constant dense<0.000000e+00> : vector<8xf32>
    %15 = vector.multi_reduction <add>, %14, %cst_6 [1] : vector<8x128xf32> to vector<8xf32>
    %16 = vector.shape_cast %15 : vector<8xf32> to vector<8x1xf32>
    %17 = arith.addf %7, %16 : vector<8x1xf32>
    %18 = vector.extract_strided_slice %5 {offsets = [0, 1], sizes = [8, 1], strides = [1, 1]} : vector<8x4xf32> to vector<8x1xf32>
    %19 = vector.extract_strided_slice %6 {offsets = [1, 0], sizes = [1, 128], strides = [1, 1]} : vector<4x128xf32> to vector<1x128xf32>
    %20 = vector.broadcast %19 : vector<1x128xf32> to vector<8x128xf32>
    %21 = vector.broadcast %18 : vector<8x1xf32> to vector<8x128xf32>
    %22 = arith.subf %20, %21 : vector<8x128xf32>
    %cst_7 = arith.constant 0.000000e+00 : f32
    %23 = vector.broadcast %cst_7 : f32 to vector<8x128xf32>
    %24 = arith.maximumf %22, %23 : vector<8x128xf32>
    %cst_8 = arith.constant dense<0.000000e+00> : vector<8xf32>
    %25 = vector.multi_reduction <add>, %24, %cst_8 [1] : vector<8x128xf32> to vector<8xf32>
    %26 = vector.shape_cast %25 : vector<8xf32> to vector<8x1xf32>
    %27 = arith.addf %17, %26 : vector<8x1xf32>
    %28 = vector.extract_strided_slice %5 {offsets = [0, 2], sizes = [8, 1], strides = [1, 1]} : vector<8x4xf32> to vector<8x1xf32>
    %29 = vector.extract_strided_slice %6 {offsets = [2, 0], sizes = [1, 128], strides = [1, 1]} : vector<4x128xf32> to vector<1x128xf32>
    %30 = vector.broadcast %29 : vector<1x128xf32> to vector<8x128xf32>
    %31 = vector.broadcast %28 : vector<8x1xf32> to vector<8x128xf32>
    %32 = arith.subf %30, %31 : vector<8x128xf32>
    %cst_9 = arith.constant 0.000000e+00 : f32
    %33 = vector.broadcast %cst_9 : f32 to vector<8x128xf32>
    %34 = arith.maximumf %32, %33 : vector<8x128xf32>
    %cst_10 = arith.constant dense<0.000000e+00> : vector<8xf32>
    %35 = vector.multi_reduction <add>, %34, %cst_10 [1] : vector<8x128xf32> to vector<8xf32>
    %36 = vector.shape_cast %35 : vector<8xf32> to vector<8x1xf32>
    %37 = arith.addf %27, %36 : vector<8x1xf32>
    %38 = vector.extract_strided_slice %5 {offsets = [0, 3], sizes = [8, 1], strides = [1, 1]} : vector<8x4xf32> to vector<8x1xf32>
    %39 = vector.extract_strided_slice %6 {offsets = [3, 0], sizes = [1, 128], strides = [1, 1]} : vector<4x128xf32> to vector<1x128xf32>
    %40 = vector.broadcast %39 : vector<1x128xf32> to vector<8x128xf32>
    %41 = vector.broadcast %38 : vector<8x1xf32> to vector<8x128xf32>
    %42 = arith.subf %40, %41 : vector<8x128xf32>
    %cst_11 = arith.constant 0.000000e+00 : f32
    %43 = vector.broadcast %cst_11 : f32 to vector<8x128xf32>
    %44 = arith.maximumf %42, %43 : vector<8x128xf32>
    %cst_12 = arith.constant dense<0.000000e+00> : vector<8xf32>
    %45 = vector.multi_reduction <add>, %44, %cst_12 [1] : vector<8x128xf32> to vector<8xf32>
    %46 = vector.shape_cast %45 : vector<8xf32> to vector<8x1xf32>
    %47 = arith.addf %37, %46 : vector<8x1xf32>
    %c0_13 = arith.constant 0 : index
    %c0_14 = arith.constant 0 : index
    %48 = vector.load %arg5[%c0_13, %c0_14] : memref<8x128xf32, #tpu.memory_space<vmem>>, vector<8x128xf32>
    %cst_15 = arith.constant dense<0.000000e+00> : vector<1xf32>
    %49 = vector.multi_reduction <add>, %47, %cst_15 [0] : vector<8x1xf32> to vector<1xf32>
    %50 = vector.shape_cast %49 : vector<1xf32> to vector<1x1xf32>
    %51 = vector.broadcast %50 : vector<1x1xf32> to vector<8x128xf32>
    %52 = arith.addf %48, %51 : vector<8x128xf32>
    %c0_16 = arith.constant 0 : index
    %c0_17 = arith.constant 0 : index
    %53 = vector.load %arg5[%c0_16, %c0_17] : memref<8x128xf32, #tpu.memory_space<vmem>>, vector<8x128xf32>
    tpu.vector_store %arg5[%c0_16, %c0_17], %52 {strides = array<i32>} : memref<8x128xf32, #tpu.memory_space<vmem>>, vector<8x128xf32>,
    return
  }
  func.func @transform_0(%arg0: i32, %arg1: i32, %arg2: i32) -> (i32, i32) {
    %c0_i32 = arith.constant 0 : i32
    return %arg0, %arg1 : i32, i32
  }
  func.func @transform_1(%arg0: i32, %arg1: i32, %arg2: i32) -> (i32, i32) {
    %c0_i32 = arith.constant 0 : i32
    return %arg1, %arg2 : i32, i32
  }
  func.func @transform_2(%arg0: i32, %arg1: i32, %arg2: i32) -> (i32, i32) {
    %c0_i32 = arith.constant 0 : i32
    %c0_i32_0 = arith.constant 0 : i32
    return %arg0, %c0_i32 : i32, i32
  }
  func.func @transform_3(%arg0: i32, %arg1: i32, %arg2: i32) -> (i32, i32) {
    %c0_i32 = arith.constant 0 : i32
    %c0_i32_0 = arith.constant 0 : i32
    return %arg0, %c0_i32 : i32, i32
  }
}

</mosaic_0001>

<bundles_post_ra>
// kernel: tpu_custom_call.1
= control target key start
LH: loop header
LB: loop body
LE: loop exit
PB: predicated region body
PF: predicated region fallthrough
CT: control target
= control target key end

     0   :  { %9 = vsyncpa [#allocation3], 0  ;;  %v171_v1 = vmov 0   ;;  %v172_v2 = vmov 2   ;;  %s210_s0 = inlined_call_operand.vmem [shape: f32[8,4], index: 0, kind: input, shape index: {}]   ;;  %s211_s1 = inlined_call_operand.vmem [shape: f32[4,128], index: 1, kind: input, shape index: {}]   ;;  %s212_s2 = inlined_call_operand.hbm [shape: f32[8,128], index: 2, kind: output, shape index: {0}]   ;;  %s213_s3 = inlined_call_operand.hbm [shape: f32[8,128], index: 3, kind: output, shape index: {1}]  }
   0x1   :  { %v23_v0 = vld [vmem:[%s210_s0] sm:$0xff]  ;;  %114 = vset.pattern.permute.xlu0 %v171_v1  ;;  %116 = vset.pattern.permute.xlu1 %v172_v2 }
   0x2   :  { %10 = vsyncpa [#allocation5], 0  ;;  %28 = vperm.xlu0 %114, %v23_v0   ;;  %48 = vperm.xlu1 %116, %v23_v0   ;;  %v173_v3 = vmov 1   ;;  %v174_v4 = vmov 3   ;;  %v24_v5 = vld [vmem:[%s211_s1] sm:$0xf] }
   0x3   :  { %v25_v6 = vperm.slane %v24_v5, 0  ;;  %v46_v7 = vperm.slane %v24_v5, 2  ;;  %v36_v14 = vperm.slane %v24_v5, 1  ;;  %v56_v17 = vperm.slane %v24_v5, 3  ;;  %s175_s0 = smov [#allocation4]   ;;  %s93_s18 = sshll.u32 %s213_s3, 4  ;;  %s94_s18 = int_to_ptr.hbm [resolvable:$true] %s93_s18 }
   0x4   :  { %s91_s1 = sshll.u32 %s175_s0, 4  ;;  %v176_v22 = vmov 0.0   ;;  %s177_s19 = smov [#allocation2]   ;;  %s92_s1 = int_to_ptr.vmem [resolvable:$true] %s91_s1 }
   0x5   :  { %22 = vst [vmem:[#allocation4] sm:$0xff] %v176_v22  ;;  %s80_s20 = sshll.u32 %s177_s19, 4  ;;  %s82_s22 = sshll.u32 %s212_s2, 4  ;;  %s81_s20 = int_to_ptr.vmem [resolvable:$true] %s80_s20  ;;  %s83_s22 = int_to_ptr.hbm [resolvable:$true] %s82_s22 }
   0x6   :  { %96 = dma.vmem_to_hbm [thread:$0]  %s92_s1, 128, %s94_s18, [#allocation5]  }
   0xa   :  { %115 = vset.pattern.permute.xlu0 %v173_v3  ;;  %117 = vset.pattern.permute.xlu1 %v174_v4 }
   0xb   :  { %38 = vperm.xlu0 %115, %v23_v0   ;;  %58 = vperm.xlu1 %117, %v23_v0  }
  0x13   :  { %118 = vset.pattern.permute.xlu0 %v174_v4 }
  0x74   :  { %v29_v8 = vpop.permute.xlu0 %28  ;;  %v49_v9 = vpop.permute.xlu1 %48 }
  0x75   :  { %v31_v10 = vsub.f32 %v25_v6, %v29_v8  ;;  %v51_v11 = vsub.f32 %v46_v7, %v49_v9 }
  0x77   :  { %v32_v12 = vmax.f32 %v31_v10, 0.0  ;;  %v52_v13 = vmax.f32 %v51_v11, 0.0 }
  0x79   :  { %33 = vadd.xlane.f32.xlu2 %v32_v12  ;;  %53 = vadd.xlane.f32.xlu1 %v52_v13 }
  0x7d   :  { %v39_v15 = vpop.permute.xlu0 %38  ;;  %v59_v18 = vpop.permute.xlu1 %58 }
  0x7e   :  { %v41_v16 = vsub.f32 %v36_v14, %v39_v15  ;;  %v61_v20 = vsub.f32 %v56_v17, %v59_v18 }
  0x80   :  { %v42_v19 = vmax.f32 %v41_v16, 0.0  ;;  %v62_v21 = vmax.f32 %v61_v20, 0.0 }
  0x82   :  { %43 = vadd.xlane.f32.xlu2 %v42_v19 }
  0x8a   :  { %63 = vadd.xlane.f32.xlu2 %v62_v21 }
  0xec   :  { %v34_v23 = vpop.xlane.xlu2 %33  ;;  %v54_v26 = vpop.xlane.xlu1 %53 }
  0xf5   :  { %v44_v24 = vpop.xlane.xlu2 %43 }
  0xf6   :  { %v45_v25 = vadd.f32 %v44_v24, %v34_v23 }
  0xf8   :  { %v55_v27 = vadd.f32 %v54_v26, %v45_v25 }
  0xfd   :  { %v64_v28 = vpop.xlane.xlu2 %63 }
  0xfe   :  { %v65_v29 = vadd.f32 %v64_v28, %v55_v27 }
 0x100   :  { %v67_v30 = vrot.slane %v65_v29, 4 }
 0x102   :  { %v68_v31 = vadd.f32 %v67_v30, %v65_v29 }
 0x104   :  { %v69_v32 = vrot.slane %v68_v31, 2 }
 0x106   :  { %v70_v33 = vadd.f32 %v69_v32, %v68_v31 }
 0x108   :  { %v71_v34 = vrot.slane %v70_v33, 1 }
 0x10a   :  { %v72_v35 = vadd.f32 %v71_v34, %v70_v33 }
 0x10c   :  { %74 = vst [vmem:[#allocation2] sm:$0xff] %v72_v35 }
 0x10d   :  { %85 = dma.vmem_to_hbm [thread:$0]  %s81_s20, 128, %s83_s22, [#allocation3]  }
 0x10e   :  { %167 = dma.done.wait [#allocation3], 128  }
 0x10f   :  { %168 = vsyncadd [#allocation3], 4294967168 }
 0x110   :  { %169 = dma.done.wait [#allocation5], 128  }
 0x111   :  { %170 = vsyncadd [#allocation5], 4294967168 }
 0x112   :  { %105 = vsyncpa [#allocation3], 1 }
 0x113   :  { %106 = vsyncpa [#allocation5], 1 }

</bundles_post_ra>
